<compile_context>
chip_gen: v7x
topology: tpu7x:2x2x1
jax: 0.10.0
libtpu: 0.0.40
codegen_flags: <defaults>
</compile_context>

<pallas_src>
import jax
import jax.numpy as jnp
from jax.experimental import pallas as pl
from jax.experimental.pallas import tpu as pltpu


_LANES = 512                   # lane-dense last dim (multiple of 128)
_MAX_BLOCK_ELEMS = 512 * 1024  # ~2 MiB of f32 per input block
_ACC_ROWS = 8                  # accumulator sublane depth


def _round_up(a, b):
    return ((a + b - 1) // b) * b


def _si_partial_kernel(x_ref, y_ref, sum_ref, sq_ref):
    i = pl.program_id(1)  # inner (reduction / "arbitrary") axis

    @pl.when(i == 0)
    def _():
        sum_ref[...] = jnp.zeros_like(sum_ref)
        sq_ref[...] = jnp.zeros_like(sq_ref)

    # Hot path: upcast -> log-diff -> elementwise accumulation (VPU + EUP only;
    # no per-step cross-lane reduce, no scalar RMW).
    d = (jnp.log(x_ref[...].astype(jnp.float32))
         - jnp.log(y_ref[...].astype(jnp.float32)))
    rows, lanes = d.shape
    d3 = d.reshape(rows // _ACC_ROWS, _ACC_ROWS, lanes)
    sum_ref[...] += jnp.sum(d3, axis=0)
    sq_ref[...] += jnp.sum(d3 * d3, axis=0)


def _prep_operand(a, padded_rows, lanes):
    # Keep bf16/f16/f32 as-is (halves DMA traffic for bf16); upcast happens
    # inside the kernel. Anything else falls back to f32.
    if a.dtype not in (jnp.bfloat16, jnp.float16, jnp.float32):
        a = a.astype(jnp.float32)
    flat = a.reshape(-1)
    pad = padded_rows * lanes - flat.shape[0]
    if pad:
        flat = jnp.pad(flat, (0, pad), constant_values=1)  # log(1) == 0
    return flat.reshape(padded_rows, lanes)


def scale_invariant_loss(x, y, *, num_splits=2):
    """x, y: (N, C, H, W) float arrays (NCHW, same as PyTorch)."""
    N, C, H, W = x.shape
    num_pixels = H * W  # matches torch: size(3) * size(2)
    total = N * C * H * W
    lanes = _LANES

    # Capacity-aware row tile (always a multiple of 8, never the whole array
    # unless it is small); rows are padded so num_splits * steps * tm == rows.
    rows = -(-total // lanes)
    tm = min(_MAX_BLOCK_ELEMS // lanes, _round_up(rows, _ACC_ROWS))
    tm = _round_up(tm, _ACC_ROWS)
    steps = -(-rows // (num_splits * tm))
    padded_rows = num_splits * steps * tm

    xs = _prep_operand(x, padded_rows, lanes)
    ys = _prep_operand(y, padded_rows, lanes)

    sum_part, sq_part = pl.pallas_call(
        _si_partial_kernel,
        out_shape=(
            jax.ShapeDtypeStruct((num_splits * _ACC_ROWS, lanes), jnp.float32),
            jax.ShapeDtypeStruct((num_splits * _ACC_ROWS, lanes), jnp.float32),
        ),
        grid_spec=pltpu.PrefetchScalarGridSpec(
            num_scalar_prefetch=0,
            grid=(num_splits, steps),
            in_specs=[
                pl.BlockSpec((tm, lanes), lambda c, i: (c * steps + i, 0)),
                pl.BlockSpec((tm, lanes), lambda c, i: (c * steps + i, 0)),
            ],
            out_specs=[
                pl.BlockSpec((_ACC_ROWS, lanes), lambda c, i: (c, 0)),
                pl.BlockSpec((_ACC_ROWS, lanes), lambda c, i: (c, 0)),
            ],
        ),
        compiler_params=pltpu.CompilerParams(
            # outer split is independent (megacore-shardable on v7x); inner
            # axis carries the resident accumulator -> "arbitrary".
            dimension_semantics=("parallel", "arbitrary"),
        ),
    )(xs, ys)

    # Tiny epilogue (a few KB): final cross-lane reduce, variance clamp, sqrt.
    n = jnp.float32(num_pixels)
    s = jnp.sum(sum_part)
    ss = jnp.sum(sq_part)
    var = ss / n - (s * s) / (n * n)
    return jnp.sqrt(jnp.maximum(var, jnp.float32(0.0)))


def _reference(x, y):
    d = jnp.log(x) - jnp.log(y)
    n = x.shape[2] * x.shape[3]
    return jnp.sqrt(jnp.sum(d * d) / n - jnp.square(jnp.sum(d)) / (n * n))


if __name__ == "__main__":
    key = jax.random.PRNGKey(0)
    k1, k2 = jax.random.split(key)
    shape = (2, 4, 16, 16)  # N, C, H, W
    # strictly positive inputs (log requires > 0), like depth maps
    x = jax.random.uniform(k1, shape, jnp.float32, minval=0.1, maxval=10.0)
    y = jax.random.uniform(k2, shape, jnp.float32, minval=0.1, maxval=10.0)

    loss = jax.block_until_ready(scale_invariant_loss(x, y))
    ref = jax.block_until_ready(_reference(x, y))

    assert loss.shape == ()
    assert jnp.allclose(loss, ref, rtol=1e-5, atol=1e-5), (loss, ref)
    print("KERNEL_OK")
</pallas_src>

<mosaic_0001>
module attributes {stable_mosaic.version = 11 : i64} {
  func.func @_si_partial_kernel(%arg0: i32, %arg1: i32, %arg2: memref<8x512xf32, #tpu.memory_space<vmem>>, %arg3: memref<8x512xf32, #tpu.memory_space<vmem>>, %arg4: memref<8x512xf32, #tpu.memory_space<vmem>>, %arg5: memref<8x512xf32, #tpu.memory_space<vmem>>) attributes {dimension_semantics = [#tpu.dimension_semantics<parallel>, #tpu.dimension_semantics<arbitrary>], iteration_bounds = array<i64: 2, 1>, scalar_prefetch = 0 : i64, scratch_operands = 0 : i64, tpu.core_type = #tpu.core_type<tc>, window_params = [{transform_indices = @transform_0, window_bounds = array<i64: 8, 512>}, {transform_indices = @transform_1, window_bounds = array<i64: 8, 512>}, {transform_indices = @transform_2, window_bounds = array<i64: 8, 512>}, {transform_indices = @transform_3, window_bounds = array<i64: 8, 512>}]} {
    %c0_i32 = arith.constant 0 : i32
    %0 = arith.cmpi eq, %arg1, %c0_i32 : i32
    %1 = arith.extui %0 : i1 to i32
    %c0_i32_0 = arith.constant 0 : i32
    %2 = arith.cmpi ne, %1, %c0_i32_0 : i32
    scf.if %2 {
      %cst_13 = arith.constant 0.000000e+00 : f32
      %18 = vector.broadcast %cst_13 : f32 to vector<8x512xf32>
      %c0_14 = arith.constant 0 : index
      %c0_15 = arith.constant 0 : index
      %19 = vector.load %arg4[%c0_14, %c0_15] : memref<8x512xf32, #tpu.memory_space<vmem>>, vector<8x512xf32>
      tpu.vector_store %arg4[%c0_14, %c0_15], %18 {strides = array<i32>} : memref<8x512xf32, #tpu.memory_space<vmem>>, vector<8x512xf32>,
      %cst_16 = arith.constant 0.000000e+00 : f32
      %20 = vector.broadcast %cst_16 : f32 to vector<8x512xf32>
      %c0_17 = arith.constant 0 : index
      %c0_18 = arith.constant 0 : index
      %21 = vector.load %arg5[%c0_17, %c0_18] : memref<8x512xf32, #tpu.memory_space<vmem>>, vector<8x512xf32>
      tpu.vector_store %arg5[%c0_17, %c0_18], %20 {strides = array<i32>} : memref<8x512xf32, #tpu.memory_space<vmem>>, vector<8x512xf32>,
    } else {
    }
    %c0 = arith.constant 0 : index
    %c0_1 = arith.constant 0 : index
    %3 = vector.load %arg2[%c0, %c0_1] : memref<8x512xf32, #tpu.memory_space<vmem>>, vector<8x512xf32>
    %4 = math.log %3 : vector<8x512xf32>
    %c0_2 = arith.constant 0 : index
    %c0_3 = arith.constant 0 : index
    %5 = vector.load %arg3[%c0_2, %c0_3] : memref<8x512xf32, #tpu.memory_space<vmem>>, vector<8x512xf32>
    %6 = math.log %5 : vector<8x512xf32>
    %7 = arith.subf %4, %6 : vector<8x512xf32>
    %8 = vector.shape_cast %7 : vector<8x512xf32> to vector<1x8x512xf32>
    %c0_4 = arith.constant 0 : index
    %c0_5 = arith.constant 0 : index
    %9 = vector.load %arg4[%c0_4, %c0_5] : memref<8x512xf32, #tpu.memory_space<vmem>>, vector<8x512xf32>
    %cst = arith.constant dense<0.000000e+00> : vector<8x512xf32>
    %10 = vector.multi_reduction <add>, %8, %cst [0] : vector<1x8x512xf32> to vector<8x512xf32>
    %11 = arith.addf %9, %10 : vector<8x512xf32>
    %c0_6 = arith.constant 0 : index
    %c0_7 = arith.constant 0 : index
    %12 = vector.load %arg4[%c0_6, %c0_7] : memref<8x512xf32, #tpu.memory_space<vmem>>, vector<8x512xf32>
    tpu.vector_store %arg4[%c0_6, %c0_7], %11 {strides = array<i32>} : memref<8x512xf32, #tpu.memory_space<vmem>>, vector<8x512xf32>,
    %c0_8 = arith.constant 0 : index
    %c0_9 = arith.constant 0 : index
    %13 = vector.load %arg5[%c0_8, %c0_9] : memref<8x512xf32, #tpu.memory_space<vmem>>, vector<8x512xf32>
    %14 = arith.mulf %8, %8 : vector<1x8x512xf32>
    %cst_10 = arith.constant dense<0.000000e+00> : vector<8x512xf32>
    %15 = vector.multi_reduction <add>, %14, %cst_10 [0] : vector<1x8x512xf32> to vector<8x512xf32>
    %16 = arith.addf %13, %15 : vector<8x512xf32>
    %c0_11 = arith.constant 0 : index
    %c0_12 = arith.constant 0 : index
    %17 = vector.load %arg5[%c0_11, %c0_12] : memref<8x512xf32, #tpu.memory_space<vmem>>, vector<8x512xf32>
    tpu.vector_store %arg5[%c0_11, %c0_12], %16 {strides = array<i32>} : memref<8x512xf32, #tpu.memory_space<vmem>>, vector<8x512xf32>,
    return
  }
  func.func @transform_0(%arg0: i32, %arg1: i32) -> (i32, i32) {
    %c1_i32 = arith.constant 1 : i32
    %0 = arith.muli %arg0, %c1_i32 : i32
    %1 = arith.addi %0, %arg1 : i32
    %c0_i32 = arith.constant 0 : i32
    %c0_i32_0 = arith.constant 0 : i32
    return %1, %c0_i32 : i32, i32
  }
  func.func @transform_1(%arg0: i32, %arg1: i32) -> (i32, i32) {
    %c1_i32 = arith.constant 1 : i32
    %0 = arith.muli %arg0, %c1_i32 : i32
    %1 = arith.addi %0, %arg1 : i32
    %c0_i32 = arith.constant 0 : i32
    %c0_i32_0 = arith.constant 0 : i32
    return %1, %c0_i32 : i32, i32
  }
  func.func @transform_2(%arg0: i32, %arg1: i32) -> (i32, i32) {
    %c0_i32 = arith.constant 0 : i32
    %c0_i32_0 = arith.constant 0 : i32
    return %arg0, %c0_i32 : i32, i32
  }
  func.func @transform_3(%arg0: i32, %arg1: i32) -> (i32, i32) {
    %c0_i32 = arith.constant 0 : i32
    %c0_i32_0 = arith.constant 0 : i32
    return %arg0, %c0_i32 : i32, i32
  }
}

</mosaic_0001>

<bundles_post_ra>
// kernel: tpu_custom_call.1
= control target key start
LH: loop header
LB: loop body
LE: loop exit
PB: predicated region body
PF: predicated region fallthrough
CT: control target
= control target key end

     0   :  { %9 = vsyncpa [#allocation3], 0  ;;  %s1083_s0 = inlined_call_operand.hbm [shape: f32[16,512], index: 0, kind: input, shape index: {}]   ;;  %s1084_s1 = inlined_call_operand.hbm [shape: f32[16,512], index: 1, kind: input, shape index: {}]   ;;  %s1085_s2 = inlined_call_operand.hbm [shape: f32[16,512], index: 2, kind: output, shape index: {0}]   ;;  %s1086_s3 = inlined_call_operand.hbm [shape: f32[16,512], index: 3, kind: output, shape index: {1}]  }
   0x1   :  { %11 = vsyncpa [#allocation3 + $0x1], 0 }
   0x2   :  { %12 = vsyncpa [#allocation6], 0 }
   0x3   :  { %14 = vsyncpa [#allocation6 + $0x1], 0 }
   0x4   :  { %15 = vsyncpa [#allocation4], 0 }
   0x5   :  { %17 = vsyncpa [#allocation4 + $0x1], 0 }
   0x6   :  { %18 = vsyncpa [#allocation9], 0 }
   0x7   :  { %20 = vsyncpa [#allocation9 + $0x1], 0  ;;  %s821_s12 = smov 0   ;;  %s823_s13 = smov 0  }
   0x8   :  { %s825_s14 = smov 0   ;;  %s827_s15 = smov 0  }
   0x9   :  { %s829_s16 = smov 0   ;;  %s831_s17 = smov 0  }
   0xa LB: > { %s501_s18 = sadd.s32 4294967295, %s795_s17   ;;  %s502_s19 = sadd.s32 4294967294, %s795_s17   ;;  %s795_s17 = sphi %s831_s17, %s26_s17   ;;  %s791_s16 = sphi %s829_s16, %s1106_s16   ;;  %s787_s15 = sphi %s827_s15, %s1105_s15   ;;  %s783_s14 = sphi %s825_s14, %s1104_s14   ;;  %s779_s13 = sphi %s823_s13, %s1103_s13   ;;  %s775_s12 = sphi %s821_s12, %s1102_s12  }
   0xb   : > { %s38_s20 = sadd.s32 1, %s791_s16  ;;  %s47_s21 = sadd.s32 1, %s783_s14 }
   0xc   : > { %p40_p0 = scmp.ge.s32.totalorder %s38_s20, 2  ;;  %p54_p1 = scmp.ne.s32.totalorder %s783_s14, %s779_s13 }
   0xd   : > { %p55_p2 = scmp.eq.s32.totalorder %s795_s17, 0  ;;  %p60_p3 = scmp.ne.s32.totalorder %s779_s13, %s775_s12 }
   0xe   : > { %s1108_s20 = smov (%p40_p0, %s38_s20), 0  ;;  %p61_p5 = scmp.eq.s32.totalorder %s501_s18, 0 }
   0xf   : > { %p862_p4 = por %p55_p2, %p54_p1  ;;  %s44_s23 = ssub.s32 %s791_s16, %s1108_s20 }
  0x10   : > { %p112_p6 = scmp.eq.s32.totalorder %s501_s18, 1  ;;  %p45_p7 = scmp.eq.s32.totalorder %s44_s23, 0 }
  0x11   : > { %p868_p8 = por %p61_p5, %p60_p3  ;;  %p118_p10 = scmp.eq.s32.totalorder %s502_s19, 1 }
  0x12   : > { %p872_p9 = por %p112_p6, %p54_p1  ;;  %p550_p13 = scmp.lt.s32.totalorder %s795_s17, 2 }
  0x13   : > { %s1090_s24 = scalar_select %p868_p8, 1, 0 }
  0x14   : > { %s1091_s25 = scalar_select %p872_p9, 1, 0 }
  0x15   : > { %s877_s26 = scalar_select %p45_p7, %s783_s14, %s47_s21  }
  0x16   : > { %p879_p11 = por %p118_p10, %p60_p3  ;;  %s886_s28 = sand.u32 1, %s783_s14  }
  0x17   : > { %s505_s29 = sshll.u32 %s886_s28, 5  ;;  %s524_s30 = sshll.u32 %s791_s16, 9 }
  0x18   : > { %s1092_s27 = scalar_select %p879_p11, 1, 0 }
  0x19   : > { %s895_s6 = scalar_lea.hbm %s1083_s0, %s524_s30  ;;  %s168_s7 = scalar_lea.vmem [#allocation2], %s505_s29 }
  0x1a   : > { %s177_s8 = sshll.u32 %s168_s7, 4  ;;  %p903_p0 = pnand %p550_p13, %p862_p4  ;;  %s899_s8 = int_to_ptr.vmem [resolvable:$true] %s177_s8 }
  0x1b   : > { %s165_s10 = scalar_lea.sflag [#allocation3], %s886_s28  ;;  %s617_s11 = scalar_lea.hbm %s895_s6, 512 }
  0x1c   : > { %p618_p3 = scmp.ne.s32.totalorder %s895_s6, %s617_s11  ;;  %p619_p5 = pneg %p903_p0 }
  0x1d   : > { %s622_s21 = scalar_lea.hbm %s1083_s0, 1024  ;;  %p623_p4 = scmp.lt.u32.totalorder %s895_s6, %s1083_s0 }
  0x1e   : > { %p620_p6 = pnand %p619_p5, %p618_p3  ;;  %p624_p10 = scmp.lt.u32.totalorder %s622_s21, %s617_s11 }
  0x1f   : > { %p626_p12 = scmp.lt.u32.totalorder %s617_s11, %s895_s6 }
  0x20   : > { %p621_p7 = pneg %p620_p6  ;;  %p625_p13 = por %p624_p10, %p623_p4 }
  0x22   : > { %p627_p1 = por %p626_p12, %p625_p13 }
  0x24   : > { %p628_p2 = pnand %p627_p1, %p621_p7 }
  0x26   : > { %631 = shalt.err (!%p628_p2)
}
  0x27   : > { %s632_s4 = scalar_lea.vmem %s899_s8, 512  ;;  %s797_s5 = smov [#allocation2]  }
  0x28   : > { %p633_p3 = scmp.ne.s32.totalorder %s899_s8, %s632_s4  ;;  %s637_s7 = sshll.u32 %s797_s5, 4  ;;  %s638_s7 = int_to_ptr.vmem [resolvable:$false] %s637_s7 }
  0x29   : > { %s639_s18 = scalar_lea.vmem %s638_s7, 1024  ;;  %p640_p9 = scmp.lt.s32.totalorder %s899_s8, %s638_s7 }
  0x2a   : > { %p635_p6 = pnand %p633_p3, %p619_p5  ;;  %p641_p4 = scmp.lt.s32.totalorder %s639_s18, %s632_s4 }
  0x2c   : > { %p636_p11 = pneg %p635_p6  ;;  %p642_p10 = por %p641_p4, %p640_p9 }
  0x2e   : > { %p643_p12 = pnand %p642_p10, %p636_p11 }
  0x30   : > { %646 = shalt.err (!%p643_p12)
}
  0x31   : > { %539 = dma.hbm_to_vmem [thread:$0]  (!%p903_p0), %s895_s6, 512, %s899_s8, %s165_s10  }
  0x32   : > { %p1094_p1 = scmp.lt.s32.totalorder %s795_s17, 3  ;;  %p1095_p2 = scmp.ge.s32.totalorder %s795_s17, 1 }
  0x33   : > { %s948_s22 = scalar_lea.hbm %s1084_s1, %s524_s30  ;;  %s188_s23 = scalar_lea.vmem [#allocation5], %s505_s29 }
  0x34   : > { %p939_p7 = pnand %p1095_p2, %p1094_p1  ;;  %s197_s4 = sshll.u32 %s188_s23, 4  ;;  %s198_s4 = int_to_ptr.vmem [resolvable:$true] %s197_s4 }
  0x35   : > { %s185_s6 = scalar_lea.sflag [#allocation6], %s886_s28  ;;  %s647_s8 = scalar_lea.hbm %s948_s22, 512 }
  0x36   : > { %s1096_s11 = scalar_select %p939_p7, 1, 0 }
  0x37   : > { %p648_p9 = scmp.ne.s32.totalorder %s948_s22, %s647_s8  ;;  %s652_s30 = scalar_lea.hbm %s1084_s1, 1024 }
  0x38   : > { %p653_p3 = scmp.lt.u32.totalorder %s948_s22, %s1084_s1  ;;  %p654_p6 = scmp.lt.u32.totalorder %s652_s30, %s647_s8 }
  0x39   : > { %p650_p11 = pnand %p648_p9, %p619_p5  ;;  %p656_p10 = scmp.lt.u32.totalorder %s647_s8, %s948_s22 }
  0x3a   : > { %p655_p4 = por %p654_p6, %p653_p3 }
  0x3b   : > { %p651_p13 = pneg %p650_p11 }
  0x3c   : > { %p657_p12 = por %p656_p10, %p655_p4 }
  0x3e   : > { %p658_p1 = pnand %p657_p12, %p651_p13 }
  0x40   : > { %661 = shalt.err (!%p658_p1)
}
  0x41   : > { %s662_s28 = scalar_lea.vmem %s198_s4, 512  ;;  %s798_s29 = smov [#allocation5]  }
  0x42   : > { %p663_p2 = scmp.ne.s32.totalorder %s198_s4, %s662_s28  ;;  %s667_s19 = sshll.u32 %s798_s29, 4  ;;  %s668_s19 = int_to_ptr.vmem [resolvable:$false] %s667_s19 }
  0x43   : > { %s669_s21 = scalar_lea.vmem %s668_s19, 1024  ;;  %p670_p8 = scmp.lt.s32.totalorder %s198_s4, %s668_s19 }
  0x44   : > { %p665_p9 = pnand %p663_p2, %p619_p5  ;;  %p671_p7 = scmp.lt.s32.totalorder %s669_s21, %s662_s28 }
  0x46   : > { %p666_p11 = pneg %p665_p9  ;;  %p672_p3 = por %p671_p7, %p670_p8 }
  0x48   : > { %p673_p6 = pnand %p672_p3, %p666_p11 }
  0x4a   : > { %676 = shalt.err (!%p673_p6)
}
  0x4b   : > { %542 = dma.hbm_to_vmem [thread:$0]  (!%p903_p0), %s948_s22, 512, %s198_s4, %s185_s6  }
  0x4c   : > { %p1097_p13 = scmp.ne.s32.totalorder %s1096_s11, 0 }
  0x4d   : > { %s975_s23 = sand.u32 (!%p1097_p13), 1, %s779_s13   ;;  %p1098_p8 = scmp.ne.s32.totalorder (!%p1097_p13), %s1090_s24, 0 }
  0x4e   : > { %206 = sbr.rel (%p1097_p13) target bundleno = 148 (0x94), region = 28  ;;  %s978_s8 = sshll.u32 (!%p1097_p13), %s975_s23, 5 }
  0x4f   : > { %s209_s10 = scalar_lea.sflag (!%p1097_p13), [#allocation3], %s975_s23  ;;  %s212_s5 = scalar_lea.vmem (!%p1097_p13), [#allocation2], %s978_s8 }
  0x55   : > { %758 = dma.done.wait (%p1098_p8), %s209_s10, 512  }
  0x56   : > { %760 = vsyncadd (%p1098_p8), %s209_s10, 4294966784  ;;  %s218_s9 = scalar_lea.sflag [#allocation6], %s975_s23  ;;  %s221_s11 = scalar_lea.vmem [#allocation5], %s978_s8 }
  0x57   : > { %762 = dma.done.wait (%p1098_p8), %s218_s9, 512  }
  0x58   : > { %764 = vsyncadd (%p1098_p8), %s218_s9, 4294966784  ;;  %v268_v0 = vld [vmem:[%s212_s5] sm:$0xff]  ;;  %v269_v2 = vld [vmem:[%s212_s5 + $0x8] sm:$0xff]  ;;  %s246_s24 = scalar_lea.vmem [#allocation7], %s978_s8  ;;  %s526_s22 = sshll.u32 %s787_s15, 9 }
  0x59   : > { %v280_v1 = vld [vmem:[%s221_s11] sm:$0xff]  ;;  %601 = vlog2.f32 %v268_v0  ;;  %v281_v3 = vld [vmem:[%s221_s11 + $0x8] sm:$0xff]  ;;  %v270_v4 = vld [vmem:[%s212_s5 + $0x10] sm:$0xff]  ;;  %s352_s4 = sshll.u32 %s246_s24, 4  ;;  %s995_s6 = scalar_lea.vmem [#allocation8], %s978_s8  ;;  %s1004_s4 = int_to_ptr.vmem [resolvable:$true] %s352_s4 }
  0x5a   : > { %603 = vlog2.f32 %v280_v1  ;;  %v282_v5 = vld [vmem:[%s221_s11 + $0x10] sm:$0xff]  ;;  %v271_v6 = vld [vmem:[%s212_s5 + $0x18] sm:$0xff]  ;;  %s366_s30 = sshll.u32 %s995_s6, 4  ;;  %s1002_s15 = scalar_lea.hbm %s1085_s2, %s526_s22  ;;  %s1013_s30 = int_to_ptr.vmem [resolvable:$true] %s366_s30 }
  0x5b   : > { %605 = vlog2.f32 %v269_v2  ;;  %v283_v7 = vld [vmem:[%s221_s11 + $0x18] sm:$0xff]  ;;  %s1011_s19 = scalar_lea.hbm %s1086_s3, %s526_s22  ;;  %s333_s21 = scalar_lea.sflag [#allocation4], %s975_s23 }
  0x5c   : > { %607 = vlog2.f32 %v281_v3  ;;  %s677_s8 = scalar_lea.vmem %s1004_s4, 512  ;;  %p1099_p5 = scmp.ne.s32.totalorder %s1091_s25, 0 }
  0x5d   : > { %609 = vlog2.f32 %v270_v4  ;;  %p678_p0 = scmp.ne.s32.totalorder %s1004_s4, %s677_s8  ;;  %s799_s10 = smov [#allocation7]  }
  0x5e   : > { %611 = vlog2.f32 %v282_v5  ;;  %s681_s5 = sshll.u32 %s799_s10, 4  ;;  %s682_s5 = int_to_ptr.vmem [resolvable:$false] %s681_s5 }
  0x5f   : > { %613 = vlog2.f32 %v271_v6  ;;  %p679_p7 = pnand %p678_p0, %p1099_p5  ;;  %s683_s9 = scalar_lea.vmem %s682_s5, 1024 }
  0x60   : > { %615 = vlog2.f32 %v283_v7  ;;  %p684_p10 = scmp.lt.s32.totalorder %s1004_s4, %s682_s5  ;;  %p685_p12 = scmp.lt.s32.totalorder %s683_s9, %s677_s8 }
  0x61   : > { %p680_p4 = pneg %p679_p7 }
  0x62   : > { %p686_p1 = por %p685_p12, %p684_p10 }
  0x63   : > { %v602_v8 = vpop.eup %601 }
  0x64   : > { %v604_v9 = vpop.eup %603  ;;  %v273_v10 = vmul.f32 0.6931472, %v602_v8  ;;  %p687_p2 = pnand %p686_p1, %p680_p4 }
  0x65   : > { %v606_v11 = vpop.eup %605  ;;  %v285_v12 = vmul.f32 0.6931472, %v604_v9 }
  0x66   : > { %v608_v13 = vpop.eup %607  ;;  %v275_v14 = vmul.f32 0.6931472, %v606_v11 }
  0x67   : > { %v610_v15 = vpop.eup %609  ;;  %v292_v16 = vsub.f32 %v273_v10, %v285_v12  ;;  %v287_v17 = vmul.f32 0.6931472, %v608_v13 }
  0x68   : > { %v612_v18 = vpop.eup %611  ;;  %v277_v19 = vmul.f32 0.6931472, %v610_v15 }
  0x69   : > { %v614_v20 = vpop.eup %613  ;;  %v293_v21 = vsub.f32 %v275_v14, %v287_v17  ;;  %v289_v22 = vmul.f32 0.6931472, %v612_v18  ;;  %v316_v23 = vmul.f32 %v292_v16, %v292_v16  ;;  %308 = vst [vmem:[%s246_s24] sm:$0xff] %v292_v16 }
  0x6a   : > { %v616_v24 = vpop.eup %615  ;;  %v279_v25 = vmul.f32 0.6931472, %v614_v20 }
  0x6b   : > { %v294_v26 = vsub.f32 %v277_v19, %v289_v22  ;;  %v291_v27 = vmul.f32 0.6931472, %v616_v24  ;;  %v317_v28 = vmul.f32 %v293_v21, %v293_v21  ;;  %309 = vst [vmem:[%s246_s24 + $0x8] sm:$0xff] %v293_v21  ;;  %328 = vst [vmem:[%s995_s6] sm:$0xff] %v316_v23 }
  0x6d   : > { %v295_v29 = vsub.f32 %v279_v25, %v291_v27  ;;  %v318_v30 = vmul.f32 %v294_v26, %v294_v26  ;;  %310 = vst [vmem:[%s246_s24 + $0x10] sm:$0xff] %v294_v26  ;;  %329 = vst [vmem:[%s995_s6 + $0x8] sm:$0xff] %v317_v28 }
  0x6f   : > { %v319_v31 = vmul.f32 %v295_v29, %v295_v29  ;;  %311 = vst [vmem:[%s246_s24 + $0x18] sm:$0xff] %v295_v29  ;;  %330 = vst [vmem:[%s995_s6 + $0x10] sm:$0xff] %v318_v30 }
  0x70   : > { %690 = shalt.err (!%p687_p2)
}
  0x71   : > { %s691_s11 = scalar_lea.hbm %s1002_s15, 512  ;;  %s695_s7 = scalar_lea.hbm %s1085_s2, 1024 }
  0x72   : > { %p692_p9 = scmp.ne.s32.totalorder %s1002_s15, %s691_s11  ;;  %p696_p6 = scmp.lt.u32.totalorder %s1002_s15, %s1085_s2 }
  0x73   : > { %p697_p13 = scmp.lt.u32.totalorder %s695_s7, %s691_s11  ;;  %p699_p0 = scmp.lt.u32.totalorder %s691_s11, %s1002_s15 }
  0x74   : > { %p693_p11 = pnand %p692_p9, %p1099_p5 }
  0x75   : > { %p698_p8 = por %p697_p13, %p696_p6 }
  0x76   : > { %p694_p3 = pneg %p693_p11 }
  0x77   : > { %p700_p7 = por %p699_p0, %p698_p8 }
  0x79   : > { %p701_p4 = pnand %p700_p7, %p694_p3 }
  0x7b   : > { %704 = shalt.err (!%p701_p4)
}
  0x7c   : > { %532 = dma.vmem_to_hbm [thread:$0]  (%p1099_p5), %s1004_s4, 512, %s1002_s15, %s333_s21   ;;  %331 = vst [vmem:[%s995_s6 + $0x18] sm:$0xff] %v319_v31 }
  0x7d   : > { %s338_s29 = scalar_lea.sflag [#allocation9], %s975_s23  ;;  %s705_s8 = scalar_lea.vmem %s1013_s30, 512 }
  0x7e   : > { %p706_p10 = scmp.ne.s32.totalorder %s1013_s30, %s705_s8  ;;  %s800_s10 = smov [#allocation8]  }
  0x7f   : > { %s709_s5 = sshll.u32 %s800_s10, 4  ;;  %s710_s5 = int_to_ptr.vmem [resolvable:$false] %s709_s5 }
  0x80   : > { %p707_p12 = pnand %p706_p10, %p1099_p5  ;;  %s711_s9 = scalar_lea.vmem %s710_s5, 1024 }
  0x81   : > { %p712_p2 = scmp.lt.s32.totalorder %s1013_s30, %s710_s5  ;;  %p713_p9 = scmp.lt.s32.totalorder %s711_s9, %s705_s8 }
  0x82   : > { %p708_p1 = pneg %p707_p12 }
  0x83   : > { %p714_p11 = por %p713_p9, %p712_p2 }
  0x85   : > { %p715_p3 = pnand %p714_p11, %p708_p1 }
  0x87   : > { %718 = shalt.err (!%p715_p3)
}
  0x88   : > { %s719_s23 = scalar_lea.hbm %s1011_s19, 512  ;;  %s723_s15 = scalar_lea.hbm %s1086_s3, 1024 }
  0x89   : > { %p720_p6 = scmp.ne.s32.totalorder %s1011_s19, %s719_s23  ;;  %p724_p0 = scmp.lt.u32.totalorder %s1011_s19, %s1086_s3 }
  0x8a   : > { %p725_p7 = scmp.lt.u32.totalorder %s723_s15, %s719_s23  ;;  %p727_p10 = scmp.lt.u32.totalorder %s719_s23, %s1011_s19 }
  0x8b   : > { %p721_p13 = pnand %p720_p6, %p1099_p5 }
  0x8c   : > { %p726_p4 = por %p725_p7, %p724_p0 }
  0x8d   : > { %p722_p8 = pneg %p721_p13 }
  0x8e   : > { %p728_p12 = por %p727_p10, %p726_p4 }
  0x90   : > { %p729_p1 = pnand %p728_p12, %p722_p8 }
  0x92   : > { %732 = shalt.err (!%p729_p1)
}
  0x93   : > { %533 = dma.vmem_to_hbm [thread:$0]  (%p1099_p5), %s1013_s30, 512, %s1011_s19, %s338_s29  }
  0x94 PF: > { %s378_s24 = sand.u32 1, %s775_s12   ;;  %p1100_p2 = scmp.ne.s32.totalorder %s1092_s27, 0 }
  0x95   : > { %p1101_p9 = scmp.ge.s32.totalorder %s795_s17, 2  ;;  %s379_s22 = scalar_lea.sflag [#allocation4], %s378_s24 }
  0x97   : > { %p544_p11 = pnand %p1101_p9, %p1100_p2 }
  0x99   : > { %766 = dma.done.wait (!%p544_p11), %s379_s22, 512  }
  0x9a   : > { %768 = vsyncadd (!%p544_p11), %s379_s22, 4294966784  ;;  %s388_s7 = scalar_lea.sflag [#allocation9], %s378_s24 }
  0x9b   : > { %770 = dma.done.wait (!%p544_p11), %s388_s7, 512  }
  0x9c   : > { %772 = vsyncadd (!%p544_p11), %s388_s7, 4294966784  ;;  %s26_s17 = sadd.s32 1, %s795_s17   ;;  %s1102_s12 = smov %s779_s13 }
  0x9d   : > { %p23_p3 = scmp.ge.s32.totalorder %s26_s17, 4   ;;  %s1103_s13 = smov %s783_s14 }
  0x9e   : > { %s1104_s14 = smov %s877_s26  ;;  %s1105_s15 = smov %s791_s16 }
  0x9f   : > { %s1106_s16 = smov %s1108_s20  ;;  %25 = sbr.rel (!%p23_p3) target bundleno = 10 (0xa), region = 107 }
  0xa6   :  { %393 = vsyncpa [#allocation3], 1 }
  0xa7   :  { %395 = vsyncpa [#allocation3 + $0x1], 1 }
  0xa8   :  { %396 = vsyncpa [#allocation6], 1 }
  0xa9   :  { %398 = vsyncpa [#allocation6 + $0x1], 1 }
  0xaa   :  { %399 = vsyncpa [#allocation4], 1 }
  0xab   :  { %401 = vsyncpa [#allocation4 + $0x1], 1 }
  0xac   :  { %402 = vsyncpa [#allocation9], 1 }
  0xad   :  { %404 = vsyncpa [#allocation9 + $0x1], 1 }

</bundles_post_ra>
